<compile_context>
chip_gen: v5e
topology: v5e:2x2
jax: 0.10.0
libtpu: 0.0.40
codegen_flags: <defaults>
</compile_context>

<pallas_src>
import functools

import jax
import jax.numpy as jnp
from jax import lax
from jax.experimental import pallas as pl
from jax.experimental.pallas import tpu as pltpu

EPS = 1e-12  # F.normalize default eps (norm clamped to at least eps)


def _netvlad_kernel(x_ref, w_ref, b_ref, cen_ref, out_ref, *,
                    cluster_count, normalize_input, block_b):
    # x_ref:   (block_b, C, L)   batch slab, channels on sublanes, spatial on lanes
    # w_ref:   (K_all, C)        1x1 conv weight (squeezed)
    # b_ref:   (K_all, 1)        conv bias (column vector for sublane broadcast)
    # cen_ref: (K, C)            non-ghost cluster centroids
    # out_ref: (block_b, K, C)   normalized VLAD descriptor (flattened in wrapper)
    w = w_ref[...]          # load params once per grid step (hoisted out of b-loop)
    bias = b_ref[...]
    cen = cen_ref[...]

    for b in range(block_b):                      # small, static, unrolled
        x = x_ref[b]                              # (C, L) float32

        if normalize_input:
            # F.normalize(dim=1): x / max(||x||, eps) == x * rsqrt(max(||x||^2, eps^2))
            nsq = jnp.sum(x * x, axis=0, keepdims=True)            # (1, L)
            x = x * lax.rsqrt(jnp.maximum(nsq, EPS * EPS))

        # 1x1 conv over channels: (K_all, C) @ (C, L) -> (K_all, L), MXU-native.
        logits = lax.dot_general(w, x, (((1,), (0,)), ((), ())),
                                 preferred_element_type=jnp.float32) + bias

        # softmax over the cluster (sublane) axis, per spatial location.
        m = jnp.max(logits, axis=0, keepdims=True)                 # (1, L)
        e = jnp.exp(logits - m)                                    # (K_all, L)
        denom = jnp.sum(e, axis=0, keepdims=True)                  # (1, L)
        a = e * pl.reciprocal(denom, approx=True)                  # EUP reciprocal

        # Ghost clusters only matter for the softmax denominator — drop them now.
        a = a[:cluster_count, :]                                   # (K, L), K % 8 == 0
        s = jnp.sum(a, axis=1, keepdims=True)                      # (K, 1)

        # vlad[k, c] = sum_l a[k, l] * x[c, l] - s[k] * cen[k, c]
        # Contract L on both operands (trans-B matmul) — no transpose materialized.
        vlad = lax.dot_general(a, x, (((1,), (1,)), ((), ())),
                               preferred_element_type=jnp.float32) - s * cen   # (K, C)

        # intra-cluster L2 normalize (dim=2 in the reference)
        rsq = jnp.sum(vlad * vlad, axis=1, keepdims=True)          # (K, 1)
        rinv = lax.rsqrt(jnp.maximum(rsq, EPS * EPS))              # (K, 1)
        vlad = vlad * rinv

        # global L2 normalize over the flattened (K*C) descriptor:
        # each normalized row has squared norm rsq * rinv^2 (== 1 unless clamped),
        # so derive the global sum from the (K,1) column instead of re-squaring (K,C).
        gsq = jnp.sum(rsq * rinv * rinv, axis=0, keepdims=True)    # (1, 1)
        vlad = vlad * lax.rsqrt(jnp.maximum(gsq, EPS * EPS))

        out_ref[b] = vlad


def _pick_block_b(n):
    """Largest divisor of n (<= 8) that still leaves >= 2 grid steps (v7x megacore)."""
    for b in (8, 4, 2, 1):
        if n % b == 0 and (n // b >= 2 or n == b == 1):
            return b
    return 1


def netvlad_forward(x_nchw, conv_w, conv_b, centroids, cluster_count,
                    normalize_input=True):
    """x_nchw: (N, C, H, W) float32; conv_w: (K_all, C); conv_b: (K_all,);
    centroids: (K_all, C).  Returns (N, cluster_count * C)."""
    N, C, H, W = x_nchw.shape
    K_all = conv_w.shape[0]
    L = H * W

    # Native layout: NCHW -> (N, C, L) is a free reshape (no HBM transpose).
    x_ncl = x_nchw.reshape(N, C, L).astype(jnp.float32)
    w = conv_w.astype(jnp.float32)
    b_col = conv_b.reshape(K_all, 1).astype(jnp.float32)
    cen = centroids[:cluster_count].astype(jnp.float32)   # ghosts never reach vlad

    block_b = _pick_block_b(N)
    kernel = functools.partial(_netvlad_kernel,
                               cluster_count=cluster_count,
                               normalize_input=normalize_input,
                               block_b=block_b)

    out = pl.pallas_call(
        kernel,
        out_shape=jax.ShapeDtypeStruct((N, cluster_count, C), jnp.float32),
        grid=(N // block_b,),
        in_specs=[
            pl.BlockSpec((block_b, C, L), lambda n: (n, 0, 0)),
            pl.BlockSpec((K_all, C), lambda n: (0, 0)),
            pl.BlockSpec((K_all, 1), lambda n: (0, 0)),
            pl.BlockSpec((cluster_count, C), lambda n: (0, 0)),
        ],
        out_specs=pl.BlockSpec((block_b, cluster_count, C), lambda n: (n, 0, 0)),
        compiler_params=pltpu.CompilerParams(dimension_semantics=("parallel",)),
    )(x_ncl, w, b_col, cen)

    # Free reshape in XLA; matches vlad.view(N, -1) (row-major over (K, C)).
    return out.reshape(N, cluster_count * C)


def _orthogonal_init(key, rows, cols):
    """Deterministic orthogonal init (same spirit as nn.init.orthogonal_)."""
    n, m = max(rows, cols), min(rows, cols)
    a = jax.random.normal(key, (n, m), dtype=jnp.float32)
    q, r = jnp.linalg.qr(a)
    q = q * jnp.sign(jnp.diagonal(r))[None, :]
    if rows < cols:
        q = q.T
    return q[:rows, :cols]


def _netvlad_ref(x_nchw, conv_w, conv_b, centroids, cluster_count,
                 normalize_input=True):
    """Pure-JAX reference mirroring the PyTorch forward."""
    N, C, H, W = x_nchw.shape
    L = H * W
    x = x_nchw.reshape(N, C, L)
    if normalize_input:
        x = x / jnp.maximum(jnp.sqrt(jnp.sum(x * x, axis=1, keepdims=True)), EPS)
    logits = jnp.einsum('ncl,kc->nkl', x, conv_w) + conv_b[None, :, None]
    a = jax.nn.softmax(logits, axis=1)
    vlad = jnp.einsum('nkl,ncl->nkc', a, x) \
        - jnp.sum(a, axis=2)[:, :, None] * centroids[None]
    vlad = vlad[:, :cluster_count, :]
    vlad = vlad / jnp.maximum(
        jnp.sqrt(jnp.sum(vlad * vlad, axis=2, keepdims=True)), EPS)
    flat = vlad.reshape(N, -1)
    return flat / jnp.maximum(
        jnp.sqrt(jnp.sum(flat * flat, axis=1, keepdims=True)), EPS)


def _check(n, c, h, w, cluster_count, ghost_cluster_count, seed):
    k_all = cluster_count + ghost_cluster_count
    key = jax.random.PRNGKey(seed)
    kx, kw, kc = jax.random.split(key, 3)

    x = jax.random.normal(kx, (n, c, h, w), dtype=jnp.float32)
    conv_w = _orthogonal_init(kw, k_all, c)          # Conv2d(C, K_all, 1) weight (squeezed)
    conv_b = jnp.zeros((k_all,), dtype=jnp.float32)  # nn.init.constant_(bias, 0.0)
    centroids = _orthogonal_init(kc, k_all, c)

    out = netvlad_forward(x, conv_w, conv_b, centroids, cluster_count)
    out = jax.block_until_ready(out)

    ref = _netvlad_ref(x, conv_w, conv_b, centroids, cluster_count)
    assert out.shape == (n, cluster_count * c)
    # Tolerance accounts for the EUP approximate reciprocal / rsqrt paths
    # (descriptor is unit-norm; errors are ~1e-4-scale in the worst case).
    assert jnp.allclose(out, ref, atol=1e-3, rtol=1e-3), \
        f"max abs diff {jnp.max(jnp.abs(out - ref))}"


if __name__ == "__main__":
    # Small shapes consistent with the module's forward (embedding_size = 32).
    # Case 1: N=2 -> block_b=1, grid=(2,) (both v7x cores active).
    _check(n=2, c=32, h=8, w=8, cluster_count=8, ghost_cluster_count=2, seed=0)
    # Case 2: N=8 -> block_b=4, grid=(2,) exercises the batched-per-step path.
    _check(n=8, c=32, h=8, w=8, cluster_count=8, ghost_cluster_count=2, seed=0)

    print("KERNEL_OK")
</pallas_src>

<mosaic_0001>
module attributes {stable_mosaic.version = 11 : i64} {
  func.func @_netvlad_kernel(%arg0: i32, %arg1: memref<1x32x64xf32, #tpu.memory_space<vmem>>, %arg2: memref<10x32xf32, #tpu.memory_space<vmem>>, %arg3: memref<10x1xf32, #tpu.memory_space<vmem>>, %arg4: memref<8x32xf32, #tpu.memory_space<vmem>>, %arg5: memref<1x8x32xf32, #tpu.memory_space<vmem>>) attributes {dimension_semantics = [#tpu.dimension_semantics<parallel>], iteration_bounds = array<i64: 2>, scalar_prefetch = 0 : i64, scratch_operands = 0 : i64, tpu.core_type = #tpu.core_type<tc>, window_params = [{transform_indices = @transform_0, window_bounds = array<i64: 1, 32, 64>}, {pipeline_mode = #tpu.pipeline_mode<synchronous>, transform_indices = @transform_1, window_bounds = array<i64: 10, 32>}, {pipeline_mode = #tpu.pipeline_mode<synchronous>, transform_indices = @transform_2, window_bounds = array<i64: 10, 1>}, {pipeline_mode = #tpu.pipeline_mode<synchronous>, transform_indices = @transform_3, window_bounds = array<i64: 8, 32>}, {transform_indices = @transform_4, window_bounds = array<i64: 1, 8, 32>}]} {
    %c0 = arith.constant 0 : index
    %c0_0 = arith.constant 0 : index
    %0 = vector.load %arg2[%c0, %c0_0] : memref<10x32xf32, #tpu.memory_space<vmem>>, vector<10x32xf32>
    %c0_1 = arith.constant 0 : index
    %c0_2 = arith.constant 0 : index
    %1 = vector.load %arg3[%c0_1, %c0_2] : memref<10x1xf32, #tpu.memory_space<vmem>>, vector<10x1xf32>
    %c0_3 = arith.constant 0 : index
    %c0_4 = arith.constant 0 : index
    %2 = vector.load %arg4[%c0_3, %c0_4] : memref<8x32xf32, #tpu.memory_space<vmem>>, vector<8x32xf32>
    %c0_5 = arith.constant 0 : index
    %c0_6 = arith.constant 0 : index
    %c0_7 = arith.constant 0 : index
    %3 = vector.load %arg1[%c0_5, %c0_6, %c0_7] : memref<1x32x64xf32, #tpu.memory_space<vmem>>, vector<1x32x64xf32>
    %4 = vector.shape_cast %3 : vector<1x32x64xf32> to vector<32x64xf32>
    %5 = arith.mulf %4, %4 : vector<32x64xf32>
    %cst = arith.constant dense<0.000000e+00> : vector<64xf32>
    %6 = vector.multi_reduction <add>, %5, %cst [0] : vector<32x64xf32> to vector<64xf32>
    %7 = vector.shape_cast %6 : vector<64xf32> to vector<1x64xf32>
    %cst_8 = arith.constant 1.000000e-24 : f32
    %8 = vector.broadcast %cst_8 : f32 to vector<1x64xf32>
    %9 = arith.maximumf %7, %8 : vector<1x64xf32>
    %10 = math.rsqrt %9 : vector<1x64xf32>
    %11 = vector.broadcast %10 : vector<1x64xf32> to vector<32x64xf32>
    %12 = arith.mulf %4, %11 : vector<32x64xf32>
    %cst_9 = arith.constant dense<0.000000e+00> : vector<10x64xf32>
    %13 = tpu.matmul %0, %12, %cst_9 {dimension_numbers = #tpu.dot_dimension_numbers<[1], [0], [0], [1], [0, 0, 1, 1], [], []>} : vector<10x32xf32>, vector<32x64xf32>, vector<10x64xf32> -> vector<10x64xf32>
    %14 = vector.broadcast %1 : vector<10x1xf32> to vector<10x64xf32>
    %15 = arith.addf %13, %14 : vector<10x64xf32>
    %cst_10 = arith.constant dense<0xFF800000> : vector<64xf32>
    %16 = vector.multi_reduction <maximumf>, %15, %cst_10 [0] : vector<10x64xf32> to vector<64xf32>
    %17 = vector.shape_cast %16 : vector<64xf32> to vector<1x64xf32>
    %18 = vector.broadcast %17 : vector<1x64xf32> to vector<10x64xf32>
    %19 = arith.subf %15, %18 : vector<10x64xf32>
    %20 = math.exp %19 : vector<10x64xf32>
    %cst_11 = arith.constant dense<0.000000e+00> : vector<64xf32>
    %21 = vector.multi_reduction <add>, %20, %cst_11 [0] : vector<10x64xf32> to vector<64xf32>
    %22 = vector.shape_cast %21 : vector<64xf32> to vector<1x64xf32>
    %23 = tpu.reciprocal %22 {approx = true} : vector<1x64xf32> -> vector<1x64xf32>
    %24 = vector.broadcast %23 : vector<1x64xf32> to vector<10x64xf32>
    %25 = arith.mulf %20, %24 : vector<10x64xf32>
    %26 = vector.extract_strided_slice %25 {offsets = [0, 0], sizes = [8, 64], strides = [1, 1]} : vector<10x64xf32> to vector<8x64xf32>
    %cst_12 = arith.constant dense<0.000000e+00> : vector<8xf32>
    %27 = vector.multi_reduction <add>, %26, %cst_12 [1] : vector<8x64xf32> to vector<8xf32>
    %28 = vector.shape_cast %27 : vector<8xf32> to vector<8x1xf32>
    %cst_13 = arith.constant dense<0.000000e+00> : vector<8x32xf32>
    %29 = tpu.matmul %26, %12, %cst_13 {dimension_numbers = #tpu.dot_dimension_numbers<[1], [1], [0], [0], [0, 0, 1, 0], [], []>} : vector<8x64xf32>, vector<32x64xf32>, vector<8x32xf32> -> vector<8x32xf32>
    %30 = vector.broadcast %28 : vector<8x1xf32> to vector<8x32xf32>
    %31 = arith.mulf %30, %2 : vector<8x32xf32>
    %32 = arith.subf %29, %31 : vector<8x32xf32>
    %33 = arith.mulf %32, %32 : vector<8x32xf32>
    %cst_14 = arith.constant dense<0.000000e+00> : vector<8xf32>
    %34 = vector.multi_reduction <add>, %33, %cst_14 [1] : vector<8x32xf32> to vector<8xf32>
    %35 = vector.shape_cast %34 : vector<8xf32> to vector<8x1xf32>
    %cst_15 = arith.constant 1.000000e-24 : f32
    %36 = vector.broadcast %cst_15 : f32 to vector<8x1xf32>
    %37 = arith.maximumf %35, %36 : vector<8x1xf32>
    %38 = math.rsqrt %37 : vector<8x1xf32>
    %39 = vector.broadcast %38 : vector<8x1xf32> to vector<8x32xf32>
    %40 = arith.mulf %32, %39 : vector<8x32xf32>
    %41 = arith.mulf %35, %38 : vector<8x1xf32>
    %42 = arith.mulf %41, %38 : vector<8x1xf32>
    %cst_16 = arith.constant dense<0.000000e+00> : vector<1xf32>
    %43 = vector.multi_reduction <add>, %42, %cst_16 [0] : vector<8x1xf32> to vector<1xf32>
    %44 = vector.shape_cast %43 : vector<1xf32> to vector<1x1xf32>
    %cst_17 = arith.constant 1.000000e-24 : f32
    %45 = vector.broadcast %cst_17 : f32 to vector<1x1xf32>
    %46 = arith.maximumf %44, %45 : vector<1x1xf32>
    %47 = math.rsqrt %46 : vector<1x1xf32>
    %48 = vector.broadcast %47 : vector<1x1xf32> to vector<8x32xf32>
    %49 = arith.mulf %40, %48 : vector<8x32xf32>
    %c0_18 = arith.constant 0 : index
    %c0_19 = arith.constant 0 : index
    %c0_20 = arith.constant 0 : index
    %50 = vector.load %arg5[%c0_18, %c0_19, %c0_20] : memref<1x8x32xf32, #tpu.memory_space<vmem>>, vector<1x8x32xf32>
    %51 = vector.shape_cast %50 : vector<1x8x32xf32> to vector<8x32xf32>
    %52 = vector.shape_cast %49 : vector<8x32xf32> to vector<1x8x32xf32>
    tpu.vector_store %arg5[%c0_18, %c0_19, %c0_20], %52 {strides = array<i32>} : memref<1x8x32xf32, #tpu.memory_space<vmem>>, vector<1x8x32xf32>,
    return
  }
  func.func @transform_0(%arg0: i32) -> (i32, i32, i32) {
    %c0_i32 = arith.constant 0 : i32
    %c0_i32_0 = arith.constant 0 : i32
    %c0_i32_1 = arith.constant 0 : i32
    return %arg0, %c0_i32, %c0_i32_0 : i32, i32, i32
  }
  func.func @transform_1(%arg0: i32) -> (i32, i32) {
    %c0_i32 = arith.constant 0 : i32
    %c0_i32_0 = arith.constant 0 : i32
    %c0_i32_1 = arith.constant 0 : i32
    return %c0_i32, %c0_i32_0 : i32, i32
  }
  func.func @transform_2(%arg0: i32) -> (i32, i32) {
    %c0_i32 = arith.constant 0 : i32
    %c0_i32_0 = arith.constant 0 : i32
    %c0_i32_1 = arith.constant 0 : i32
    return %c0_i32, %c0_i32_0 : i32, i32
  }
  func.func @transform_3(%arg0: i32) -> (i32, i32) {
    %c0_i32 = arith.constant 0 : i32
    %c0_i32_0 = arith.constant 0 : i32
    %c0_i32_1 = arith.constant 0 : i32
    return %c0_i32, %c0_i32_0 : i32, i32
  }
  func.func @transform_4(%arg0: i32) -> (i32, i32, i32) {
    %c0_i32 = arith.constant 0 : i32
    %c0_i32_0 = arith.constant 0 : i32
    %c0_i32_1 = arith.constant 0 : i32
    return %arg0, %c0_i32, %c0_i32_0 : i32, i32, i32
  }
}

</mosaic_0001>

<bundles_post_ra>
// kernel: tpu_custom_call.1
= control target key start
LH: loop header
LB: loop body
LE: loop exit
PB: predicated region body
PF: predicated region fallthrough
CT: control target
= control target key end

     0   :  { %s949_s0 = inlined_call_operand.hbm [shape: f32[2,32,64], index: 0, kind: input, shape index: {}]   ;;  %s950_s1 = inlined_call_operand.vmem [shape: f32[10,32], index: 1, kind: input, shape index: {}]   ;;  %s951_s2 = inlined_call_operand.vmem [shape: f32[10,1], index: 2, kind: input, shape index: {}]   ;;  %s952_s3 = inlined_call_operand.hbm [shape: f32[8,32], index: 3, kind: input, shape index: {}]   ;;  %s953_s4 = inlined_call_operand.hbm [shape: f32[2,8,32], index: 4, kind: output, shape index: {}]  }
   0x1   :  { %954 = sst [smem:[#allocation11_spill]] %s952_s3 }
   0x2   :  { %9 = vsyncpa [#allocation3], 0 }
   0x3   :  { %11 = vsyncpa [#allocation3 + $0x1], 0 }
   0x4   :  { %12 = vsyncpa [#allocation6], 0 }
   0x5   :  { %13 = vsyncpa [#allocation4], 0 }
   0x6   :  { %15 = vsyncpa [#allocation4 + $0x1], 0  ;;  %s776_s15 = smov 0   ;;  %s778_s16 = smov 0  }
   0x7   :  { %s780_s17 = smov 0   ;;  %s782_s18 = smov 0  }
   0x8 LB: > { %s797_s19 = sadd.s32 4294967295, %s745_s18   ;;  %s515_s20 = sadd.s32 4294967294, %s745_s18   ;;  %s745_s18 = sphi %s782_s18, %s966_s18   ;;  %s741_s17 = sphi %s780_s17, %s965_s17   ;;  %s737_s16 = sphi %s778_s16, %s964_s16   ;;  %s733_s15 = sphi %s776_s15, %s963_s15  }
   0x9   : > { %s801_s21 = sadd.s32 1, %s745_s18   ;;  %s28_s22 = sadd.s32 1, %s741_s17 }
   0xa   : > { %s25_s23 = ssub.s32 %s745_s18, %s801_s21  ;;  %p35_p0 = scmp.ne.s32.totalorder %s741_s17, %s737_s16 }
   0xb   : > { %p26_p1 = scmp.eq.s32.totalorder %s25_s23, 0  ;;  %p36_p2 = scmp.eq.s32.totalorder %s745_s18, 0 }
   0xc   : > { %p41_p3 = scmp.ne.s32.totalorder %s737_s16, %s733_s15  ;;  %p42_p4 = scmp.eq.s32.totalorder %s797_s19, 0 }
   0xd   : > { %s813_s24 = scalar_select %p26_p1, %s741_s17, %s28_s22  }
   0xe   : > { %p815_p5 = por %p36_p2, %p35_p0  ;;  %p821_p6 = por %p42_p4, %p41_p3 }
   0xf   : > { %p128_p7 = scmp.eq.s32.totalorder %s797_s19, 1  ;;  %p134_p8 = scmp.eq.s32.totalorder %s515_s20, 1 }
  0x10   : > { %p516_p9 = scmp.ge.s32.totalorder %s745_s18, 1  ;;  %p141_p10 = scmp.lt.s32.totalorder %s745_s18, 3 }
  0x11   : > { %p828_p11 = por %p128_p7, %p35_p0  ;;  %p832_p12 = por %p134_p8, %p41_p3 }
  0x12   : > { %p836_p13 = pnand %p516_p9, %p141_p10  ;;  %s960_s3 = sld [smem:[#allocation11_spill]] }
  0x13   : > { %s747_s7 = smov [#allocation5]   ;;  %p563_p3 = scmp.lt.s32.totalorder %s745_s18, 2 }
  0x14   : > { %p550_p1 = pneg %p836_p13  ;;  %s161_s8 = sshll.u32 %s747_s7, 4  ;;  %s162_s8 = int_to_ptr.vmem [resolvable:$true] %s161_s8 }
  0x15   : > { %s172_s9 = sand.u32 1, %s741_s17   ;;  %p852_p7 = pnand %p563_p3, %p815_p5 }
  0x16   : > { %p551_p2 = pnand %p550_p1, %p42_p4  ;;  %s519_s11 = sshll.u32 %s172_s9, 5 }
  0x17   : > { %s537_s12 = sshll.u32 %s745_s18, 5  ;;  %s176_s23 = scalar_lea.vmem [#allocation2], %s519_s11 }
  0x18   : > { %s159_s6 = sshll.u32 %s960_s3, 4  ;;  %s181_s20 = scalar_lea.hbm %s949_s0, %s537_s12  ;;  %s160_s6 = int_to_ptr.hbm [resolvable:$true] %s159_s6 }
  0x19   : > { %553 = dma.hbm_to_vmem [thread:$0]  (!%p551_p2), %s160_s6, 128, %s162_s8, [#allocation6]  }
  0x1a   : > { %s182_s22 = sshll.u32 %s181_s20, 4  ;;  %s184_s30 = sshll.u32 %s176_s23, 4  ;;  %s183_s22 = int_to_ptr.hbm [resolvable:$true] %s182_s22  ;;  %s185_s30 = int_to_ptr.vmem [resolvable:$true] %s184_s30 }
  0x1b   : > { %s173_s5 = scalar_lea.sflag [#allocation3], %s172_s9  ;;  %s645_s7 = sshra.s32 %s183_s22, 4  ;;  %s646_s7 = int_to_ptr.hbm [resolvable:$true] %s645_s7 }
  0x1c   : > { %s647_s25 = scalar_lea.hbm %s646_s7, 32  ;;  %p649_p8 = pneg %p852_p7 }
  0x1d   : > { %p648_p5 = scmp.ne.s32.totalorder %s646_s7, %s647_s25  ;;  %s652_s3 = scalar_lea.hbm %s949_s0, 64 }
  0x1e   : > { %p653_p1 = scmp.lt.s32.totalorder %s646_s7, %s949_s0  ;;  %p654_p2 = scmp.lt.s32.totalorder %s652_s3, %s647_s25 }
  0x1f   : > { %p650_p9 = pnand %p649_p8, %p648_p5 }
  0x20   : > { %p655_p3 = por %p654_p2, %p653_p1 }
  0x21   : > { %p651_p10 = pneg %p650_p9 }
  0x23   : > { %p656_p0 = pnand %p655_p3, %p651_p10 }
  0x25   : > { %659 = shalt.err (!%p656_p0)
}
  0x26   : > { %s748_s9 = smov 128   ;;  %s749_s11 = smov 8  }
  0x27   : > { %557 = dma.hbm_to_vmem [thread:$0]  (!%p852_p7), %s183_s22, 512, %s185_s30, %s173_s5, %s748_s9, %s748_s9, %s749_s11  }
  0x28   : > { %196 = sbr.rel (%p836_p13) target bundleno = 592 (0x250), region = 36  ;;  %s873_s14 = sand.u32 (!%p836_p13), 1, %s737_s16  }
  0x29   : > { %s523_s20 = sshll.u32 (!%p836_p13), %s873_s14, 5  ;;  %s199_s23 = scalar_lea.sflag (!%p836_p13), [#allocation3], %s873_s14 }
  0x2a   : > { %s202_s3 = scalar_lea.vmem (!%p836_p13), [#allocation2], %s523_s20 }
  0x2d   : > { %720 = dma.done.wait (%p821_p6), %s199_s23, 512  }
  0x2e   : > { %722 = vsyncadd (%p821_p6), %s199_s23, 4294966784 }
  0x2f   : > { %724 = dma.done.wait (%p42_p4), [#allocation6], 128  }
  0x30   : > { %726 = vsyncadd (%p42_p4), [#allocation6], 4294967168  ;;  %v238_v0 = vld [vmem:[%s202_s3] sm:$0xff]  ;;  %v239_v1 = vld [vmem:[%s202_s3 + $0x8] sm:$0xff]  ;;  %vm246_vm0 = vcmask 523264   ;;  %v750_v20 = vmov 0  }
  0x31   : > { %v240_v2 = vld [vmem:[%s202_s3 + $0x10] sm:$0xff]  ;;  %v241_v3 = vld [vmem:[%s202_s3 + $0x18] sm:$0xff]  ;;  %v242_v4 = vmul.f32 %v238_v0, %v238_v0  ;;  %v243_v5 = vmul.f32 %v239_v1, %v239_v1  ;;  %602 = vset.pattern.permute.xlu0 %v750_v20  ;;  %v235_v21 = vld [vmem:[%s951_s2] sm:$0xff]  ;;  %vm285_vm4 = vcmask 261120   ;;  %vm316_vm5 = vcmask 517120   ;;  %s525_s6 = sshll.u32 %s873_s14, 3 }
  0x32   : > { %v244_v6 = vmul.f32 %v240_v2, %v240_v2  ;;  %v245_v7 = vmul.f32 %v241_v3, %v241_v3  ;;  %277 = vperm.xlu0 %602, %v235_v21   ;;  %v236_v24 = vld [vmem:[%s951_s2 + $0x8] sm:$0x3]  ;;  %v233_v36 = vld [vmem:[%s950_s1] sm:$0xff]  ;;  %s534_s8 = sshll.u32 %s797_s19, 3  ;;  %s232_s11 = scalar_lea.vmem [#allocation7], %s525_s6 }
  0x33   : > { %v247_v8 = vsel %vm246_vm0, %v242_v4, 0.0  ;;  %v248_v9 = vsel %vm246_vm0, %v243_v5, 0.0  ;;  %v234_v37 = vld [vmem:[%s950_s1 + $0x8] sm:$0x3]  ;;  %s430_s9 = scalar_lea.hbm %s953_s4, %s534_s8  ;;  %s432_s20 = sshll.u32 %s232_s11, 4  ;;  %s433_s20 = int_to_ptr.vmem [resolvable:$true] %s432_s20 }
  0x34   : > { %v250_v10 = vsel %vm246_vm0, %v244_v6, 0.0  ;;  %v249_v11 = vadd.f32 %v248_v9, %v247_v8  ;;  %v252_v12 = vsel %vm246_vm0, %v245_v7, 0.0  ;;  %v237_v7 = vld [vmem:[#allocation5] sm:$0xff]  ;;  %s434_s23 = sshll.u32 %s430_s9, 4  ;;  %s420_s19 = scalar_lea.sflag [#allocation4], %s873_s14  ;;  %s435_s23 = int_to_ptr.hbm [resolvable:$true] %s434_s23 }
  0x35   : > { %s689_s3 = sshra.s32 %s435_s23, 4  ;;  %s695_s22 = scalar_lea.hbm %s953_s4, 16  ;;  %s690_s3 = int_to_ptr.hbm [resolvable:$true] %s689_s3 }
  0x36   : > { %v251_v13 = vadd.f32 %v250_v10, %v249_v11  ;;  %s691_s26 = scalar_lea.hbm %s690_s3, 8  ;;  %p696_p0 = scmp.lt.s32.totalorder %s690_s3, %s953_s4 }
  0x37   : > { %p692_p4 = scmp.ne.s32.totalorder %s690_s3, %s691_s26  ;;  %p697_p7 = scmp.lt.s32.totalorder %s695_s22, %s691_s26 }
  0x38   : > { %v253_v14 = vadd.f32 %v252_v12, %v251_v13 }
  0x39   : > { %p693_p6 = pnand %p692_p4, %p828_p11  ;;  %p698_p5 = por %p697_p7, %p696_p0 }
  0x3a   : > { %v254_v15 = vrot.slane %v253_v14, 4  ;;  %282 = vperm.xlu0 %602, %v236_v24  }
  0x3b   : > { %p694_p13 = pneg %p693_p6 }
  0x3c   : > { %v255_v16 = vadd.f32 %v254_v15, %v253_v14 }
  0x3d   : > { %p699_p8 = pnand %p698_p5, %p694_p13 }
  0x3e   : > { %v256_v17 = vrot.slane %v255_v16, 2 }
  0x40   : > { %v257_v18 = vadd.f32 %v256_v17, %v255_v16 }
  0x42   : > { %v258_v19 = vrot.slane %v257_v18, 1 }
  0x44   : > { %v259_v22 = vadd.f32 %v258_v19, %v257_v18 }
  0x46   : > { %v260_v23 = vmax.f32 %v259_v22, 1e-24 }
  0x48   : > { %603 = vrsqrt.f32 %v260_v23  ;;  %vm267_vm1 = vweird.f32 %v260_v23 }
  0x4e   : > { %v604_v25 = vpop.eup %603 }
  0x4f   : > { %v262_v26 = vmul.f32 %v604_v25, %v260_v23  ;;  %vm268_vm2 = vweird.f32 %v604_v25 }
  0x50   : > { %vm269_vm3 = vmor %vm267_vm1, %vm268_vm2 }
  0x51   : > { %v263_v27 = vmul.f32 %v604_v25, %v262_v26 }
  0x53   : > { %v264_v28 = vmul.f32 0.5, %v263_v27 }
  0x55   : > { %v265_v29 = vsub.f32 1.5, %v264_v28 }
  0x57   : > { %v266_v30 = vmul.f32 %v604_v25, %v265_v29 }
  0x59   : > { %v270_v31 = vsel %vm269_vm3, %v604_v25, %v266_v30 }
  0x5a   : > { %v274_v32 = vmul.f32 %v270_v31, %v241_v3  ;;  %v273_v33 = vmul.f32 %v270_v31, %v240_v2  ;;  %v272_v34 = vmul.f32 %v270_v31, %v239_v1  ;;  %v271_v35 = vmul.f32 %v270_v31, %v238_v0 }
  0x5c   : > { %304 = vmatpush.msra.mxu0 %v274_v32  ;;  %538 = vmatpush.msra.mxu2 %v274_v32 }
  0x5d   : > { %528 = vmatpush.xpose.msk.msra.mxu1 %vm246_vm0, %v274_v32 }
  0x5e   : > { %305 = vmatpush.msra.mxu0 %v273_v33  ;;  %539 = vmatpush.msra.mxu2 %v273_v33 }
  0x60   : > { %306 = vmatpush.msra.mxu0 %v272_v34  ;;  %540 = vmatpush.msra.mxu2 %v272_v34 }
  0x61   : > { %529 = vmatpush.xpose.msk.msra.mxu1 %vm246_vm0, %v273_v33 }
  0x62   : > { %307 = vmatpush.msra.mxu0 %v271_v35  ;;  %541 = vmatpush.msra.mxu2 %v271_v35 }
  0x63   : > { %526 = vmatmul.msk.f32.vlgmr.msra.gmra.mxu0 %vm285_vm4, %v233_v36  ;;  %527 = vmatmul.msk.f32.vlgmr.msra.gmra.mxu2 %vm285_vm4, %v234_v37 }
  0x65   : > { %530 = vmatpush.xpose.msk.msra.mxu1 %vm246_vm0, %v272_v34 }
  0x69   : > { %531 = vmatpush.xpose.msk.msra.mxu1 %vm246_vm0, %v271_v35 }
  0xa4   : > { %v278_v38 = vpop.permute.xlu0 %277 }
  0xac   : > { %v283_v41 = vpop.permute.xlu0 %282 }
  0xe0   : > { %v309_v39 = vpop.f32.mrf.mxu0 }
  0xe1   : > { %v310_v40 = vadd.f32 %v309_v39, %v278_v38 }
  0xe3   : > { %v315_v44 = vsel %vm246_vm0, %v310_v40, -inf }
  0xe6   : > { %v312_v42 = vpop.f32.mrf.mxu2 }
  0xe7   : > { %v313_v43 = vadd.f32 %v312_v42, %v283_v41 }
  0xe9   : > { %v317_v45 = vsel %vm316_vm5, %v313_v43, -inf }
  0xea   : > { %v318_v46 = vmax.f32 %v315_v44, %v317_v45 }
  0xec   : > { %v319_v47 = vrot.slane %v318_v46, 4 }
  0xee   : > { %v320_v48 = vmax.f32 %v318_v46, %v319_v47 }
  0xf0   : > { %v321_v49 = vrot.slane %v320_v48, 2 }
  0xf2   : > { %v322_v50 = vmax.f32 %v320_v48, %v321_v49 }
  0xf4   : > { %v323_v51 = vrot.slane %v322_v50, 1 }
  0xf6   : > { %v324_v52 = vmax.f32 %v322_v50, %v323_v51 }
  0xf8   : > { %v325_v53 = vsub.f32 %v310_v40, %v324_v52  ;;  %v326_v54 = vsub.f32 %v313_v43, %v324_v52 }
  0xfa   : > { %v327_v55 = vmul.f32 1.442695, %v325_v53  ;;  %v329_v56 = vmul.f32 1.442695, %v326_v54 }
  0xfc   : > { %605 = vpow2.f32 %v327_v55 }
  0xfd   : > { %607 = vpow2.f32 %v329_v56 }
 0x102   : > { %v606_v57 = vpop.eup %605 }
 0x103   : > { %v608_v58 = vpop.eup %607  ;;  %v331_v59 = vsel %vm246_vm0, %v606_v57, 0.0 }
 0x104   : > { %v332_v60 = vsel %vm316_vm5, %v608_v58, 0.0 }
 0x105   : > { %v333_v61 = vadd.f32 %v332_v60, %v331_v59 }
 0x107   : > { %v334_v62 = vrot.slane %v333_v61, 4 }
 0x109   : > { %v335_v63 = vadd.f32 %v334_v62, %v333_v61 }
 0x10b   : > { %v336_v0 = vrot.slane %v335_v63, 2 }
 0x10d   : > { %v337_v1 = vadd.f32 %v336_v0, %v335_v63 }
 0x10f   : > { %v338_v2 = vrot.slane %v337_v1, 1 }
 0x111   : > { %v339_v3 = vadd.f32 %v338_v2, %v337_v1 }
 0x113   : > { %609 = vrcp.f32 %v339_v3 }
 0x119   : > { %v610_v4 = vpop.eup %609 }
 0x11a   : > { %v341_v5 = vmul.f32 %v610_v4, %v606_v57 }
 0x11c   : > { %532 = vmatmul.msk.f32.vlgmr.msra.gmra.mxu1 %vm246_vm0, %v341_v5  ;;  %v342_v6 = vsel %vm246_vm0, %v341_v5, 0.0 }
 0x11d   : > { %343 = vadd.xlane.f32.xlu1 %v342_v6 }
 0x190   : > { %v344_v8 = vpop.xlane.xlu1 %343 }
 0x191   : > { %v380_v9 = vmul.f32 %v344_v8, %v237_v7 }
 0x199   : > { %v377_v10 = vpop.f32.mrf.mxu1 }
 0x19a   : > { %v381_v11 = vsub.f32 %v377_v10, %v380_v9 }
 0x19c   : > { %v382_v12 = vmul.f32 %v381_v11, %v381_v11 }
 0x19e   : > { %v383_v13 = vsel %vm285_vm4, %v382_v12, 0.0 }
 0x19f   : > { %384 = vadd.xlane.f32.xlu1 %v383_v13 }
 0x212   : > { %v385_v14 = vpop.xlane.xlu1 %384 }
 0x213   : > { %v386_v15 = vmax.f32 %v385_v14, 1e-24 }
 0x215   : > { %611 = vrsqrt.f32 %v386_v15  ;;  %vm393_vm7 = vweird.f32 %v386_v15 }
 0x21b   : > { %v612_v16 = vpop.eup %611 }
 0x21c   : > { %v388_v17 = vmul.f32 %v612_v16, %v386_v15  ;;  %vm394_vm6 = vweird.f32 %v612_v16 }
 0x21d   : > { %vm395_vm8 = vmor %vm393_vm7, %vm394_vm6 }
 0x21e   : > { %v389_v18 = vmul.f32 %v612_v16, %v388_v17 }
 0x220   : > { %v390_v19 = vmul.f32 0.5, %v389_v18 }
 0x222   : > { %v391_v20 = vsub.f32 1.5, %v390_v19 }
 0x224   : > { %v392_v21 = vmul.f32 %v612_v16, %v391_v20 }
 0x226   : > { %v396_v22 = vsel %vm395_vm8, %v612_v16, %v392_v21 }
 0x227   : > { %v398_v23 = vmul.f32 %v396_v22, %v385_v14  ;;  %v397_v38 = vmul.f32 %v396_v22, %v381_v11 }
 0x229   : > { %v399_v24 = vmul.f32 %v398_v23, %v396_v22 }
 0x22b   : > { %v400_v25 = vrot.slane %v399_v24, 4 }
 0x22d   : > { %v401_v26 = vadd.f32 %v400_v25, %v399_v24 }
 0x22f   : > { %v402_v27 = vrot.slane %v401_v26, 2 }
 0x231   : > { %v403_v28 = vadd.f32 %v402_v27, %v401_v26 }
 0x233   : > { %v404_v29 = vrot.slane %v403_v28, 1 }
 0x235   : > { %v405_v30 = vadd.f32 %v404_v29, %v403_v28 }
 0x237   : > { %v406_v31 = vmax.f32 %v405_v30, 1e-24 }
 0x239   : > { %613 = vrsqrt.f32 %v406_v31  ;;  %vm413_vm10 = vweird.f32 %v406_v31 }
 0x23f   : > { %v614_v32 = vpop.eup %613 }
 0x240   : > { %v408_v33 = vmul.f32 %v614_v32, %v406_v31  ;;  %vm414_vm9 = vweird.f32 %v614_v32 }
 0x241   : > { %vm415_vm11 = vmor %vm413_vm10, %vm414_vm9 }
 0x242   : > { %v409_v34 = vmul.f32 %v614_v32, %v408_v33 }
 0x244   : > { %v410_v35 = vmul.f32 0.5, %v409_v34 }
 0x246   : > { %v411_v36 = vsub.f32 1.5, %v410_v35 }
 0x248   : > { %v412_v37 = vmul.f32 %v614_v32, %v411_v36 }
 0x24a   : > { %v416_v39 = vsel %vm415_vm11, %v614_v32, %v412_v37 }
 0x24b   : > { %v417_v40 = vmul.f32 %v416_v39, %v397_v38 }
 0x24d   : > { %418 = vst.msk [vmem:[%s232_s11] sm:$0xff] %vm285_vm4, %v417_v40 }
 0x24e   : > { %702 = shalt.err (!%p699_p8)
}
 0x24f   : > { %548 = dma.vmem_to_hbm [thread:$0]  (%p828_p11), %s433_s20, 128, %s435_s23, %s420_s19  }
 0x250 PF: > { %s446_s14 = sand.u32 1, %s733_s15   ;;  %p962_p9 = scmp.ge.s32.totalorder %s745_s18, 2 }
 0x251   : > { %s447_s7 = scalar_lea.sflag [#allocation4], %s446_s14 }
 0x252   : > { %p559_p10 = pnand %p962_p9, %p832_p12 }
 0x254   : > { %p560_p1 = pneg %p559_p10 }
 0x256   : > { %728 = dma.done.wait (%p560_p1), %s447_s7, 128  }
 0x257   : > { %730 = vsyncadd (%p560_p1), %s447_s7, 4294967168  ;;  %p18_p2 = scmp.ge.s32.totalorder %s801_s21, 4   ;;  %s963_s15 = smov %s737_s16 }
 0x258   : > { %s964_s16 = smov %s741_s17  ;;  %s965_s17 = smov %s813_s24 }
 0x259   : > { %s966_s18 = smov %s801_s21  ;;  %20 = sbr.rel (!%p18_p2) target bundleno = 8 (0x8), region = 85 }
 0x25e   :  { %453 = vsyncpa [#allocation3], 1 }
 0x25f   :  { %455 = vsyncpa [#allocation3 + $0x1], 1 }
 0x260   :  { %456 = vsyncpa [#allocation6], 1 }
 0x261   :  { %457 = vsyncpa [#allocation4], 1 }
 0x262   :  { %459 = vsyncpa [#allocation4 + $0x1], 1 }

</bundles_post_ra>
